<compile_context>
chip_gen: v7x
topology: tpu7x:2x2x1
jax: 0.10.0
libtpu: 0.0.40
codegen_flags: <defaults>
</compile_context>

<pallas_src>
import functools

import jax
import jax.numpy as jnp
from jax.experimental import pallas as pl
from jax.experimental.pallas import tpu as pltpu


# ---------------------------------------------------------------------------
# Pallas kernels: full-K matmul + bias (+ residual) (+ ReLU), bf16 output
# ---------------------------------------------------------------------------
def _matmul_bias_kernel(a_ref, b_ref, bias_ref, o_ref, *, relu):
    y = jnp.dot(a_ref[...], b_ref[...], preferred_element_type=jnp.float32)
    y = y + bias_ref[...]
    if relu:
        y = jnp.maximum(y, 0.0)
    o_ref[...] = y.astype(o_ref.dtype)


def _matmul_bias_res_kernel(a_ref, b_ref, bias_ref, res_ref, o_ref, *, relu):
    y = jnp.dot(a_ref[...], b_ref[...], preferred_element_type=jnp.float32)
    y = y + bias_ref[...] + res_ref[...].astype(jnp.float32)
    if relu:
        y = jnp.maximum(y, 0.0)
    o_ref[...] = y.astype(o_ref.dtype)


# ---------------------------------------------------------------------------
# Tiling helpers
# ---------------------------------------------------------------------------
def _round_up(x, m):
    return (x + m - 1) // m * m


def _pad2d(x, rows, cols):
    r, c = x.shape
    if (r, c) == (rows, cols):
        return x
    return jnp.pad(x, ((0, rows - r), (0, cols - c)))


def _fused_conv_bias(a, b, bias, residual=None, relu=True, keep_padded=False):
    """Fused conv-as-matmul: a (M, K) bf16 patches, b (K, N) bf16 scale-folded
    weights, bias (1, N) f32.  Returns bf16 (M, N) (or padded if keep_padded)."""
    M, K = a.shape
    _, N = b.shape

    k_pad = _round_up(K, 128)
    n_pad = _round_up(N, 128)
    tn = 256 if n_pad % 256 == 0 else 128   # lane-dense, 256-aligned when possible

    # Largest M tile whose double-buffered working set (full-K A block,
    # full-K B block, bf16 out/res tiles) stays well under v7x's 64 MiB/TC.
    budget = 40 * 1024 * 1024
    m_align = _round_up(M, 8)
    tm = 8
    for cand in (1024, 512, 256, 128, 64, 32, 16, 8):
        if cand > m_align:
            continue
        # Avoid large padding waste when M is only a couple of tiles big.
        if cand > 128 and M < 4 * cand:
            continue
        vmem = 2 * (cand * k_pad * 2 + k_pad * tn * 2 + cand * tn * 2)
        if residual is not None:
            vmem += 2 * cand * tn * 2
        if vmem <= budget:
            tm = cand
            break
    m_pad = _round_up(M, tm)

    # v7x has 2 TensorCores: make sure there are >= 2 parallel blocks to shard.
    if m_pad // tm == 1 and n_pad // tn == 1 and tm >= 16:
        tm //= 2
        m_pad = _round_up(M, tm)

    a_p = _pad2d(a, m_pad, k_pad)                       # bf16
    b_p = _pad2d(b, k_pad, n_pad)                       # bf16 (scale pre-folded)
    bias_p = _pad2d(bias.astype(jnp.float32), 1, n_pad)

    # Grid: j (output-channel blocks) outer, i (row blocks) inner, so the
    # weight block's index map is constant along the inner axis and each
    # weight column block is fetched from HBM exactly once.
    grid = (n_pad // tn, m_pad // tm)

    a_spec = pl.BlockSpec((tm, k_pad), lambda j, i: (i, 0))
    b_spec = pl.BlockSpec((k_pad, tn), lambda j, i: (0, j))
    bias_spec = pl.BlockSpec((1, tn), lambda j, i: (0, j))
    out_spec = pl.BlockSpec((tm, tn), lambda j, i: (i, j))

    in_specs = [a_spec, b_spec, bias_spec]
    args = [a_p, b_p, bias_p]
    if residual is not None:
        res = residual.astype(jnp.bfloat16)
        r, c = res.shape
        if (r, c) != (m_pad, n_pad):
            res = _pad2d(res[:m_pad, :n_pad], m_pad, n_pad)
        in_specs.append(pl.BlockSpec((tm, tn), lambda j, i: (i, j)))
        args.append(res)
        kern = functools.partial(_matmul_bias_res_kernel, relu=relu)
    else:
        kern = functools.partial(_matmul_bias_kernel, relu=relu)

    flops = 2 * m_pad * k_pad * n_pad
    bytes_accessed = int(sum(x.size * x.dtype.itemsize for x in args)
                         + m_pad * n_pad * 2)

    out = pl.pallas_call(
        kern,
        out_shape=jax.ShapeDtypeStruct((m_pad, n_pad), jnp.bfloat16),
        grid_spec=pltpu.PrefetchScalarGridSpec(
            num_scalar_prefetch=0,
            grid=grid,
            in_specs=in_specs,
            out_specs=out_spec,
        ),
        compiler_params=pltpu.CompilerParams(
            dimension_semantics=("parallel", "parallel"),
            vmem_limit_bytes=48 * 1024 * 1024,
        ),
        cost_estimate=pl.CostEstimate(
            flops=flops, transcendentals=0, bytes_accessed=bytes_accessed),
    )(*args)

    if keep_padded:
        return out           # padded rows/cols only ever feed padded rows/cols
    return out[:M, :N]


# ---------------------------------------------------------------------------
# JAX glue: bf16 im2col patches, BN folding into weights
# ---------------------------------------------------------------------------
def _im2col(x_nhwc, kh, kw, stride, pad):
    """Patch matrix in the activation's dtype (bf16 on the internal path)."""
    n, h, w, c = x_nhwc.shape
    xp = jnp.pad(x_nhwc, ((0, 0), (pad, pad), (pad, pad), (0, 0)))
    ho = (h + 2 * pad - kh) // stride + 1
    wo = (w + 2 * pad - kw) // stride + 1
    cols = []
    for i in range(kh):
        for j in range(kw):
            cols.append(xp[:, i:i + ho * stride:stride,
                           j:j + wo * stride:stride, :])
    patches = jnp.stack(cols, axis=3)          # (N, Ho, Wo, KH*KW, C)
    return patches.reshape(n * ho * wo, kh * kw * c), (n, ho, wo)


def _fold_bn(bn_params, eps=1e-5):
    gamma, beta, mean, var = bn_params
    scale = gamma / jnp.sqrt(var + eps)
    bias = beta - mean * scale
    return scale, bias


def _prep_weight(w_oihw, scale):
    """(Cout, Cin, KH, KW) -> (KH*KW*Cin, Cout) bf16 with BN scale folded in."""
    cout, cin, kh, kw = w_oihw.shape
    w = jnp.transpose(w_oihw, (2, 3, 1, 0)).reshape(kh * kw * cin, cout)
    return (w * scale[None, :]).astype(jnp.bfloat16)


def basic_block_forward_nhwc(x_nhwc, params, stride):
    """BasicBlock.forward on NHWC input (preferred entry point in a network)."""
    n, h, w, cin = x_nhwc.shape
    cout = params["conv1_w"].shape[0]
    x_bf = x_nhwc.astype(jnp.bfloat16)

    # ---- shortcut path ----
    if "conv_sc_w" in params:
        s_sc, bi_sc = _fold_bn(params["bn_sc"])
        a_sc, _ = _im2col(x_bf, 1, 1, stride, 0)
        b_sc = _prep_weight(params["conv_sc_w"], s_sc)
        residual = _fused_conv_bias(a_sc, b_sc, bi_sc.reshape(1, -1),
                                    relu=False, keep_padded=True)
    else:
        residual = x_bf.reshape(n * h * w, cin)

    # ---- conv1 -> bn1 -> relu ----
    s1, bi1 = _fold_bn(params["bn1"])
    a1, (_, ho, wo) = _im2col(x_bf, 3, 3, stride, 1)
    b1 = _prep_weight(params["conv1_w"], s1)
    y1 = _fused_conv_bias(a1, b1, bi1.reshape(1, -1), relu=True)
    y1 = y1.reshape(n, ho, wo, cout)                       # bf16

    # ---- conv2 -> bn2 -> (+residual) -> relu (fused epilogue) ----
    s2, bi2 = _fold_bn(params["bn2"])
    a2, _ = _im2col(y1, 3, 3, 1, 1)
    b2 = _prep_weight(params["conv2_w"], s2)
    y2 = _fused_conv_bias(a2, b2, bi2.reshape(1, -1),
                          residual=residual, relu=True)
    return y2.reshape(n, ho, wo, cout)


def basic_block_forward(x_nchw, params, stride):
    """NCHW/f32 wrapper matching the PyTorch module interface."""
    x = jnp.transpose(x_nchw, (0, 2, 3, 1))                 # NHWC
    out = basic_block_forward_nhwc(x, params, stride)
    return jnp.transpose(out, (0, 3, 1, 2)).astype(x_nchw.dtype)


# ---------------------------------------------------------------------------
# Pure-JAX f32 reference (lax.conv) for correctness checking
# ---------------------------------------------------------------------------
def _reference_block(x_nchw, params, stride):
    def conv(x, w, s, p):
        return jax.lax.conv_general_dilated(
            x, w, (s, s), [(p, p), (p, p)],
            dimension_numbers=("NCHW", "OIHW", "NCHW"))

    def bn(x, bn_params):
        gamma, beta, mean, var = bn_params
        scale = gamma / jnp.sqrt(var + 1e-5)
        bias = beta - mean * scale
        return x * scale[None, :, None, None] + bias[None, :, None, None]

    residual = x_nchw
    if "conv_sc_w" in params:
        residual = bn(conv(x_nchw, params["conv_sc_w"], stride, 0),
                      params["bn_sc"])
    y = jax.nn.relu(bn(conv(x_nchw, params["conv1_w"], stride, 1),
                       params["bn1"]))
    y = bn(conv(y, params["conv2_w"], 1, 1), params["bn2"])
    return jax.nn.relu(y + residual)


# ---------------------------------------------------------------------------
# Deterministic parameter construction + demo
# ---------------------------------------------------------------------------
def _make_params(key, cin, cout, stride):
    keys = jax.random.split(key, 12)

    def bn_params(k0, k1, k2, k3, c):
        gamma = jax.random.uniform(k0, (c,), jnp.float32, 0.5, 1.5)
        beta = jax.random.normal(k1, (c,), jnp.float32) * 0.1
        mean = jax.random.normal(k2, (c,), jnp.float32) * 0.1
        var = jax.random.uniform(k3, (c,), jnp.float32, 0.5, 1.5)
        return (gamma, beta, mean, var)

    params = {
        "conv1_w": jax.random.normal(keys[0], (cout, cin, 3, 3),
                                     jnp.float32) * 0.1,
        "bn1": bn_params(keys[1], keys[2], keys[3], keys[4], cout),
        "conv2_w": jax.random.normal(keys[5], (cout, cout, 3, 3),
                                     jnp.float32) * 0.1,
        "bn2": bn_params(keys[6], keys[7], keys[8], keys[9], cout),
    }
    if cin != cout or stride != 1:
        params["conv_sc_w"] = jax.random.normal(
            keys[10], (cout, cin, 1, 1), jnp.float32) * 0.1
        params["bn_sc"] = bn_params(*jax.random.split(keys[11], 4), cout)
    return params


if __name__ == "__main__":
    key = jax.random.PRNGKey(0)
    k_x, k_p = jax.random.split(key)

    N, CIN, COUT, H, W, STRIDE = 2, 4, 8, 16, 16, 2
    x = jax.random.normal(k_x, (N, CIN, H, W), jnp.float32)
    params = _make_params(k_p, CIN, COUT, STRIDE)

    out = jax.jit(functools.partial(basic_block_forward,
                                    stride=STRIDE))(x, params)
    out = jax.block_until_ready(out)

    ref = _reference_block(x, params, STRIDE)
    assert out.shape == ref.shape == (N, COUT, H // STRIDE, W // STRIDE)
    # bf16 operands + bf16 intermediates (f32 MXU accumulation) -> looser
    # tolerance than the pure-f32 reference.
    assert jnp.allclose(out, ref, rtol=8e-2, atol=8e-2), "mismatch vs reference"

    print("KERNEL_OK")
</pallas_src>

<mosaic_0001>
module attributes {stable_mosaic.version = 11 : i64} {
  func.func @_matmul_bias_kernel(%arg0: i32, %arg1: i32, %arg2: memref<64x128xbf16, #tpu.memory_space<vmem>>, %arg3: memref<128x128xbf16, #tpu.memory_space<vmem>>, %arg4: memref<1x128xf32, #tpu.memory_space<vmem>>, %arg5: memref<64x128xbf16, #tpu.memory_space<vmem>>) attributes {dimension_semantics = [#tpu.dimension_semantics<parallel>, #tpu.dimension_semantics<parallel>], iteration_bounds = array<i64: 1, 2>, scalar_prefetch = 0 : i64, scratch_operands = 0 : i64, tpu.core_type = #tpu.core_type<tc>, window_params = [{transform_indices = @transform_0, window_bounds = array<i64: 64, 128>}, {transform_indices = @transform_1, window_bounds = array<i64: 128, 128>}, {transform_indices = @transform_2, window_bounds = array<i64: 1, 128>}, {transform_indices = @transform_3, window_bounds = array<i64: 64, 128>}]} {
    %c0 = arith.constant 0 : index
    %c0_0 = arith.constant 0 : index
    %0 = vector.load %arg2[%c0, %c0_0] : memref<64x128xbf16, #tpu.memory_space<vmem>>, vector<64x128xbf16>
    %c0_1 = arith.constant 0 : index
    %c0_2 = arith.constant 0 : index
    %1 = vector.load %arg3[%c0_1, %c0_2] : memref<128x128xbf16, #tpu.memory_space<vmem>>, vector<128x128xbf16>
    %cst = arith.constant dense<0.000000e+00> : vector<64x128xf32>
    %2 = tpu.matmul %0, %1, %cst {dimension_numbers = #tpu.dot_dimension_numbers<[1], [0], [0], [1], [0, 0, 1, 1], [], []>} : vector<64x128xbf16>, vector<128x128xbf16>, vector<64x128xf32> -> vector<64x128xf32>
    %c0_3 = arith.constant 0 : index
    %c0_4 = arith.constant 0 : index
    %3 = vector.load %arg4[%c0_3, %c0_4] : memref<1x128xf32, #tpu.memory_space<vmem>>, vector<1x128xf32>
    %4 = vector.broadcast %3 : vector<1x128xf32> to vector<64x128xf32>
    %5 = arith.addf %2, %4 : vector<64x128xf32>
    %cst_5 = arith.constant 0.000000e+00 : f32
    %6 = vector.broadcast %cst_5 : f32 to vector<64x128xf32>
    %7 = arith.maximumf %5, %6 : vector<64x128xf32>
    %8 = arith.truncf %7 : vector<64x128xf32> to vector<64x128xbf16>
    %c0_6 = arith.constant 0 : index
    %c0_7 = arith.constant 0 : index
    %9 = vector.load %arg5[%c0_6, %c0_7] : memref<64x128xbf16, #tpu.memory_space<vmem>>, vector<64x128xbf16>
    tpu.vector_store %arg5[%c0_6, %c0_7], %8 {strides = array<i32>} : memref<64x128xbf16, #tpu.memory_space<vmem>>, vector<64x128xbf16>,
    return
  }
  func.func @transform_0(%arg0: i32, %arg1: i32) -> (i32, i32) {
    %c0_i32 = arith.constant 0 : i32
    %c0_i32_0 = arith.constant 0 : i32
    return %arg1, %c0_i32 : i32, i32
  }
  func.func @transform_1(%arg0: i32, %arg1: i32) -> (i32, i32) {
    %c0_i32 = arith.constant 0 : i32
    %c0_i32_0 = arith.constant 0 : i32
    return %c0_i32, %arg0 : i32, i32
  }
  func.func @transform_2(%arg0: i32, %arg1: i32) -> (i32, i32) {
    %c0_i32 = arith.constant 0 : i32
    %c0_i32_0 = arith.constant 0 : i32
    return %c0_i32, %arg0 : i32, i32
  }
  func.func @transform_3(%arg0: i32, %arg1: i32) -> (i32, i32) {
    %c0_i32 = arith.constant 0 : i32
    return %arg1, %arg0 : i32, i32
  }
}

module attributes {stable_mosaic.version = 11 : i64} {
  func.func @_matmul_bias_kernel(%arg0: i32, %arg1: i32, %arg2: memref<64x128xbf16, #tpu.memory_space<vmem>>, %arg3: memref<128x128xbf16, #tpu.memory_space<vmem>>, %arg4: memref<1x128xf32, #tpu.memory_space<vmem>>, %arg5: memref<64x128xbf16, #tpu.memory_space<vmem>>) attributes {dimension_semantics = [#tpu.dimension_semantics<parallel>, #tpu.dimension_semantics<parallel>], iteration_bounds = array<i64: 1, 2>, scalar_prefetch = 0 : i64, scratch_operands = 0 : i64, tpu.core_type = #tpu.core_type<tc>, window_params = [{transform_indices = @transform_0, window_bounds = array<i64: 64, 128>}, {transform_indices = @transform_1, window_bounds = array<i64: 128, 128>}, {transform_indices = @transform_2, window_bounds = array<i64: 1, 128>}, {transform_indices = @transform_3, window_bounds = array<i64: 64, 128>}]} {
    %c0 = arith.constant 0 : index
    %c0_0 = arith.constant 0 : index
    %0 = vector.load %arg2[%c0, %c0_0] : memref<64x128xbf16, #tpu.memory_space<vmem>>, vector<64x128xbf16>
    %c0_1 = arith.constant 0 : index
    %c0_2 = arith.constant 0 : index
    %1 = vector.load %arg3[%c0_1, %c0_2] : memref<128x128xbf16, #tpu.memory_space<vmem>>, vector<128x128xbf16>
    %cst = arith.constant dense<0.000000e+00> : vector<64x128xf32>
    %2 = tpu.matmul %0, %1, %cst {dimension_numbers = #tpu.dot_dimension_numbers<[1], [0], [0], [1], [0, 0, 1, 1], [], []>} : vector<64x128xbf16>, vector<128x128xbf16>, vector<64x128xf32> -> vector<64x128xf32>
    %c0_3 = arith.constant 0 : index
    %c0_4 = arith.constant 0 : index
    %3 = vector.load %arg4[%c0_3, %c0_4] : memref<1x128xf32, #tpu.memory_space<vmem>>, vector<1x128xf32>
    %4 = vector.broadcast %3 : vector<1x128xf32> to vector<64x128xf32>
    %5 = arith.addf %2, %4 : vector<64x128xf32>
    %6 = arith.truncf %5 : vector<64x128xf32> to vector<64x128xbf16>
    %c0_5 = arith.constant 0 : index
    %c0_6 = arith.constant 0 : index
    %7 = vector.load %arg5[%c0_5, %c0_6] : memref<64x128xbf16, #tpu.memory_space<vmem>>, vector<64x128xbf16>
    tpu.vector_store %arg5[%c0_5, %c0_6], %6 {strides = array<i32>} : memref<64x128xbf16, #tpu.memory_space<vmem>>, vector<64x128xbf16>,
    return
  }
  func.func @transform_0(%arg0: i32, %arg1: i32) -> (i32, i32) {
    %c0_i32 = arith.constant 0 : i32
    %c0_i32_0 = arith.constant 0 : i32
    return %arg1, %c0_i32 : i32, i32
  }
  func.func @transform_1(%arg0: i32, %arg1: i32) -> (i32, i32) {
    %c0_i32 = arith.constant 0 : i32
    %c0_i32_0 = arith.constant 0 : i32
    return %c0_i32, %arg0 : i32, i32
  }
  func.func @transform_2(%arg0: i32, %arg1: i32) -> (i32, i32) {
    %c0_i32 = arith.constant 0 : i32
    %c0_i32_0 = arith.constant 0 : i32
    return %c0_i32, %arg0 : i32, i32
  }
  func.func @transform_3(%arg0: i32, %arg1: i32) -> (i32, i32) {
    %c0_i32 = arith.constant 0 : i32
    return %arg1, %arg0 : i32, i32
  }
}

module attributes {stable_mosaic.version = 11 : i64} {
  func.func @_matmul_bias_res_kernel(%arg0: i32, %arg1: i32, %arg2: memref<64x128xbf16, #tpu.memory_space<vmem>>, %arg3: memref<128x128xbf16, #tpu.memory_space<vmem>>, %arg4: memref<1x128xf32, #tpu.memory_space<vmem>>, %arg5: memref<64x128xbf16, #tpu.memory_space<vmem>>, %arg6: memref<64x128xbf16, #tpu.memory_space<vmem>>) attributes {dimension_semantics = [#tpu.dimension_semantics<parallel>, #tpu.dimension_semantics<parallel>], iteration_bounds = array<i64: 1, 2>, scalar_prefetch = 0 : i64, scratch_operands = 0 : i64, tpu.core_type = #tpu.core_type<tc>, window_params = [{transform_indices = @transform_0, window_bounds = array<i64: 64, 128>}, {transform_indices = @transform_1, window_bounds = array<i64: 128, 128>}, {transform_indices = @transform_2, window_bounds = array<i64: 1, 128>}, {transform_indices = @transform_3, window_bounds = array<i64: 64, 128>}, {transform_indices = @transform_4, window_bounds = array<i64: 64, 128>}]} {
    %c0 = arith.constant 0 : index
    %c0_0 = arith.constant 0 : index
    %0 = vector.load %arg2[%c0, %c0_0] : memref<64x128xbf16, #tpu.memory_space<vmem>>, vector<64x128xbf16>
    %c0_1 = arith.constant 0 : index
    %c0_2 = arith.constant 0 : index
    %1 = vector.load %arg3[%c0_1, %c0_2] : memref<128x128xbf16, #tpu.memory_space<vmem>>, vector<128x128xbf16>
    %cst = arith.constant dense<0.000000e+00> : vector<64x128xf32>
    %2 = tpu.matmul %0, %1, %cst {dimension_numbers = #tpu.dot_dimension_numbers<[1], [0], [0], [1], [0, 0, 1, 1], [], []>} : vector<64x128xbf16>, vector<128x128xbf16>, vector<64x128xf32> -> vector<64x128xf32>
    %c0_3 = arith.constant 0 : index
    %c0_4 = arith.constant 0 : index
    %3 = vector.load %arg4[%c0_3, %c0_4] : memref<1x128xf32, #tpu.memory_space<vmem>>, vector<1x128xf32>
    %4 = vector.broadcast %3 : vector<1x128xf32> to vector<64x128xf32>
    %5 = arith.addf %2, %4 : vector<64x128xf32>
    %c0_5 = arith.constant 0 : index
    %c0_6 = arith.constant 0 : index
    %6 = vector.load %arg5[%c0_5, %c0_6] : memref<64x128xbf16, #tpu.memory_space<vmem>>, vector<64x128xbf16>
    %7 = arith.extf %6 : vector<64x128xbf16> to vector<64x128xf32>
    %8 = arith.addf %5, %7 : vector<64x128xf32>
    %cst_7 = arith.constant 0.000000e+00 : f32
    %9 = vector.broadcast %cst_7 : f32 to vector<64x128xf32>
    %10 = arith.maximumf %8, %9 : vector<64x128xf32>
    %11 = arith.truncf %10 : vector<64x128xf32> to vector<64x128xbf16>
    %c0_8 = arith.constant 0 : index
    %c0_9 = arith.constant 0 : index
    %12 = vector.load %arg6[%c0_8, %c0_9] : memref<64x128xbf16, #tpu.memory_space<vmem>>, vector<64x128xbf16>
    tpu.vector_store %arg6[%c0_8, %c0_9], %11 {strides = array<i32>} : memref<64x128xbf16, #tpu.memory_space<vmem>>, vector<64x128xbf16>,
    return
  }
  func.func @transform_0(%arg0: i32, %arg1: i32) -> (i32, i32) {
    %c0_i32 = arith.constant 0 : i32
    %c0_i32_0 = arith.constant 0 : i32
    return %arg1, %c0_i32 : i32, i32
  }
  func.func @transform_1(%arg0: i32, %arg1: i32) -> (i32, i32) {
    %c0_i32 = arith.constant 0 : i32
    %c0_i32_0 = arith.constant 0 : i32
    return %c0_i32, %arg0 : i32, i32
  }
  func.func @transform_2(%arg0: i32, %arg1: i32) -> (i32, i32) {
    %c0_i32 = arith.constant 0 : i32
    %c0_i32_0 = arith.constant 0 : i32
    return %c0_i32, %arg0 : i32, i32
  }
  func.func @transform_3(%arg0: i32, %arg1: i32) -> (i32, i32) {
    %c0_i32 = arith.constant 0 : i32
    return %arg1, %arg0 : i32, i32
  }
  func.func @transform_4(%arg0: i32, %arg1: i32) -> (i32, i32) {
    %c0_i32 = arith.constant 0 : i32
    return %arg1, %arg0 : i32, i32
  }
}

</mosaic_0001>

<bundles_post_ra>
// kernel: basic_block_forward.4
= control target key start
LH: loop header
LB: loop body
LE: loop exit
PB: predicated region body
PF: predicated region fallthrough
CT: control target
= control target key end

     0   :  { %s741_s12 = smov 0   ;;  %s743_s13 = smov 0   ;;  %s814_s0 = inlined_call_operand.vmem [shape: bf16[128,128], index: 0, kind: input, shape index: {}]   ;;  %s815_s1 = inlined_call_operand.vmem [shape: bf16[128,128], index: 1, kind: input, shape index: {}]   ;;  %s816_s2 = inlined_call_operand.vmem [shape: f32[1,128], index: 2, kind: input, shape index: {}]   ;;  %s817_s3 = inlined_call_operand.vmem [shape: bf16[128,128], index: 3, kind: output, shape index: {}]  }
   0x1   :  { %s745_s14 = smov 0  }
   0x2 LB: > { %s22_s15 = sadd.s32 1, %s715_s13  ;;  %p550_p0 = scmp.ge.s32.totalorder %s719_s14, 1  ;;  %s719_s14 = sphi %s745_s14, %s13_s14   ;;  %s715_s13 = sphi %s743_s13, %s819_s13   ;;  %s711_s12 = sphi %s741_s12, %s818_s12  }
   0x3   : > { %p23_p1 = scmp.ge.s32.totalorder %s22_s15, 2  ;;  %p169_p2 = scmp.lt.s32.totalorder %s719_s14, 3 }
   0x5   : > { %s821_s15 = smov (%p23_p1, %s22_s15), 0  ;;  %p170_p3 = pnand %p550_p0, %p169_p2 }
   0x6   : > { %v685_v0 = vld [vmem:[%s815_s1] sm:$0xff] (!%p170_p3)   ;;  %s551_s18 = sshll.u32 (!%p170_p3), %s711_s12, 3  ;;  %v686_v1 = vld [vmem:[%s815_s1 + $0x8] sm:$0xff] (!%p170_p3)   ;;  %v687_v2 = vld [vmem:[%s815_s1 + $0x10] sm:$0xff] (!%p170_p3)  }
   0x7   : > { %173 = sbr.rel (%p170_p3) target bundleno = 261 (0x105), region = 32  ;;  %p204_p4 = scmp.lt.s32.totalorder (!%p170_p3), %s551_s18, 15  ;;  %621 = vmatprep.subr.bf16.mxu0 (!%p170_p3), %v685_v0  ;;  %645 = vmatprep.subr.bf16.mxu1 (!%p170_p3), %v685_v0  ;;  %v688_v3 = vld [vmem:[%s815_s1 + $0x18] sm:$0xff] (!%p170_p3)   ;;  %v689_v6 = vld [vmem:[%s815_s1 + $0x20] sm:$0xff] (!%p170_p3)   ;;  %v690_v7 = vld [vmem:[%s815_s1 + $0x28] sm:$0xff] (!%p170_p3)  }
   0x8   : > { %622 = vmatpush3.bf16.msra.mxu0 (!%p170_p3), %v685_v0  ;;  %653 = vmatpush3.bf16.msra.mxu1 (!%p170_p3), %v685_v0  ;;  %v691_v8 = vld [vmem:[%s815_s1 + $0x30] sm:$0xff] (!%p170_p3)   ;;  %v692_v9 = vld [vmem:[%s815_s1 + $0x38] sm:$0xff] (!%p170_p3)   ;;  %v555_v12 = vld [vmem:[%s816_s2] ss:$0 sm:$0xff] (!%p170_p3) }
   0x9   : > { %623 = vmatprep.subr.bf16.mxu0 (!%p170_p3), %v686_v1  ;;  %646 = vmatprep.subr.bf16.mxu1 (!%p170_p3), %v686_v1 }
   0xc   : > { %624 = vmatpush3.bf16.msra.mxu0 (!%p170_p3), %v686_v1  ;;  %654 = vmatpush3.bf16.msra.mxu1 (!%p170_p3), %v686_v1 }
   0xd   : > { %625 = vmatprep.subr.bf16.mxu0 (!%p170_p3), %v687_v2  ;;  %647 = vmatprep.subr.bf16.mxu1 (!%p170_p3), %v687_v2 }
   0xe   : > { %s823_s18 = smov (!%p204_p4, %s551_s18), 15 }
   0xf   : > { %s552_s23 = sshll.u32 %s823_s18, 2 }
  0x10   : > { %s776_s26 = scalar_lea.vmem %s814_s0, %s552_s23  ;;  %626 = vmatpush3.bf16.msra.mxu0 %v687_v2  ;;  %655 = vmatpush3.bf16.msra.mxu1 %v687_v2  ;;  %s223_s17 = scalar_lea.vmem %s817_s3, %s552_s23 }
  0x11   : > { %v693_v4 = vld [vmem:[%s776_s26] sm:$0xff]   ;;  %v694_v5 = vld [vmem:[%s776_s26 + $0x10] sm:$0xff]   ;;  %627 = vmatprep.subr.bf16.mxu0 %v688_v3  ;;  %648 = vmatprep.subr.bf16.mxu1 %v688_v3  ;;  %v695_v10 = vld [vmem:[%s776_s26 + $0x8] sm:$0xff]  }
  0x12   : > { %637 = vmatprep.mubr.bf16.mxu0 %v693_v4  ;;  %641 = vmatprep.mubr.bf16.mxu1 %v694_v5  ;;  %v696_v11 = vld [vmem:[%s776_s26 + $0x18] sm:$0xff]  }
  0x14   : > { %628 = vmatpush3.bf16.msra.mxu0 %v688_v3  ;;  %656 = vmatpush3.bf16.msra.mxu1 %v688_v3 }
  0x15   : > { %629 = vmatprep.subr.bf16.mxu0 %v689_v6  ;;  %649 = vmatprep.subr.bf16.mxu1 %v689_v6 }
  0x18   : > { %630 = vmatpush3.bf16.msra.mxu0 %v689_v6  ;;  %657 = vmatpush3.bf16.msra.mxu1 %v689_v6 }
  0x19   : > { %631 = vmatprep.subr.bf16.mxu0 %v690_v7  ;;  %650 = vmatprep.subr.bf16.mxu1 %v690_v7 }
  0x1c   : > { %632 = vmatpush3.bf16.msra.mxu0 %v690_v7  ;;  %658 = vmatpush3.bf16.msra.mxu1 %v690_v7 }
  0x1d   : > { %633 = vmatprep.subr.bf16.mxu0 %v691_v8  ;;  %651 = vmatprep.subr.bf16.mxu1 %v691_v8 }
  0x20   : > { %634 = vmatpush3.bf16.msra.mxu0 %v691_v8  ;;  %659 = vmatpush3.bf16.msra.mxu1 %v691_v8 }
  0x21   : > { %635 = vmatprep.subr.bf16.mxu0 %v692_v9  ;;  %652 = vmatprep.subr.bf16.mxu1 %v692_v9 }
  0x24   : > { %636 = vmatpush3.bf16.msra.mxu0 %v692_v9  ;;  %660 = vmatpush3.bf16.msra.mxu1 %v692_v9 }
  0x27   : > { %638 = vmatmul.mubr.bf16.vlgmr.msra.gmra.mrb[0].mxu0 %v695_v10  ;;  %642 = vmatmul.mubr.bf16.vlgmr.msra.gmra.mrb[0].mxu1 %v696_v11 }
  0xfa   : > { %v639_v13 = vpop.f32.mrb[0].mxu0  ;;  %v643_v14 = vpop.f32.mrb[0].mxu1 }
  0xfb   : > { %v372_v15 = vadd.f32 %v639_v13, %v555_v12  ;;  %v388_v16 = vadd.f32 %v643_v14, %v555_v12  ;;  %v363_v17 = vpop.f32.mrb[1].mxu0  ;;  %v379_v18 = vpop.f32.mrb[1].mxu1 }
  0xfc   : > { %v364_v19 = vadd.f32 %v555_v12, %v363_v17  ;;  %v380_v20 = vadd.f32 %v555_v12, %v379_v18  ;;  %v640_v21 = vpop.f32.mrb[2].mxu0  ;;  %v644_v22 = vpop.f32.mrb[2].mxu1 }
  0xfd   : > { %v375_v23 = vadd.f32 %v640_v21, %v555_v12  ;;  %v391_v24 = vadd.f32 %v644_v22, %v555_v12  ;;  %v366_v25 = vpop.f32.mrb[3].mxu0  ;;  %v382_v26 = vpop.f32.mrb[3].mxu1  ;;  %v396_v29 = vmax.f32 %v372_v15, 0.0  ;;  %v400_v30 = vmax.f32 %v388_v16, 0.0 }
  0xfe   : > { %v367_v27 = vadd.f32 %v555_v12, %v366_v25  ;;  %v383_v28 = vadd.f32 %v555_v12, %v382_v26  ;;  %v394_v33 = vmax.f32 %v364_v19, 0.0  ;;  %v398_v34 = vmax.f32 %v380_v20, 0.0 }
  0xff   : > { %v397_v31 = vmax.f32 %v375_v23, 0.0  ;;  %v401_v32 = vmax.f32 %v391_v24, 0.0 }
 0x100   : > { %v395_v35 = vmax.f32 %v367_v27, 0.0  ;;  %v399_v36 = vmax.f32 %v383_v28, 0.0 }
 0x101   : > { %v594_v37 = vpack.c.bf16 %v397_v31, %v396_v29  ;;  %v604_v38 = vpack.c.bf16 %v401_v32, %v400_v30 }
 0x102   : > { %v589_v39 = vpack.c.bf16 %v395_v35, %v394_v33  ;;  %v599_v40 = vpack.c.bf16 %v399_v36, %v398_v34 }
 0x103   : > { %606 = vst [vmem:[%s223_s17 + $0x8] sm:$0xff] %v594_v37   ;;  %608 = vst [vmem:[%s223_s17 + $0x18] sm:$0xff] %v604_v38  }
 0x104   : > { %590 = vst [vmem:[%s223_s17] sm:$0xff] %v589_v39   ;;  %607 = vst [vmem:[%s223_s17 + $0x10] sm:$0xff] %v599_v40  }
 0x105 PF: > { %s13_s14 = sadd.s32 1, %s719_s14   ;;  %s818_s12 = smov %s715_s13 }
 0x106   : > { %p10_p5 = scmp.ge.s32.totalorder %s13_s14, 4   ;;  %s819_s13 = smov %s821_s15 }
 0x108   :  { %12 = sbr.rel (!%p10_p5) target bundleno = 2 (0x2), region = 68 }

// kernel: basic_block_forward.3
= control target key start
LH: loop header
LB: loop body
LE: loop exit
PB: predicated region body
PF: predicated region fallthrough
CT: control target
= control target key end

     0   :  { %s733_s12 = smov 0   ;;  %s735_s13 = smov 0   ;;  %s806_s0 = inlined_call_operand.vmem [shape: bf16[128,128], index: 0, kind: input, shape index: {}]   ;;  %s807_s1 = inlined_call_operand.vmem [shape: bf16[128,128], index: 1, kind: input, shape index: {}]   ;;  %s808_s2 = inlined_call_operand.vmem [shape: f32[1,128], index: 2, kind: input, shape index: {}]   ;;  %s809_s3 = inlined_call_operand.vmem [shape: bf16[128,128], index: 3, kind: output, shape index: {}]  }
   0x1   :  { %s737_s14 = smov 0  }
   0x2 LB: > { %s22_s15 = sadd.s32 1, %s707_s13  ;;  %p542_p0 = scmp.ge.s32.totalorder %s711_s14, 1  ;;  %s711_s14 = sphi %s737_s14, %s13_s14   ;;  %s707_s13 = sphi %s735_s13, %s811_s13   ;;  %s703_s12 = sphi %s733_s12, %s810_s12  }
   0x3   : > { %p23_p1 = scmp.ge.s32.totalorder %s22_s15, 2  ;;  %p169_p2 = scmp.lt.s32.totalorder %s711_s14, 3 }
   0x5   : > { %s813_s15 = smov (%p23_p1, %s22_s15), 0  ;;  %p170_p3 = pnand %p542_p0, %p169_p2 }
   0x6   : > { %v677_v0 = vld [vmem:[%s807_s1] sm:$0xff] (!%p170_p3)   ;;  %s543_s18 = sshll.u32 (!%p170_p3), %s703_s12, 3  ;;  %v678_v1 = vld [vmem:[%s807_s1 + $0x8] sm:$0xff] (!%p170_p3)   ;;  %v679_v2 = vld [vmem:[%s807_s1 + $0x10] sm:$0xff] (!%p170_p3)  }
   0x7   : > { %173 = sbr.rel (%p170_p3) target bundleno = 259 (0x103), region = 32  ;;  %p204_p4 = scmp.lt.s32.totalorder (!%p170_p3), %s543_s18, 15  ;;  %613 = vmatprep.subr.bf16.mxu0 (!%p170_p3), %v677_v0  ;;  %637 = vmatprep.subr.bf16.mxu1 (!%p170_p3), %v677_v0  ;;  %v680_v3 = vld [vmem:[%s807_s1 + $0x18] sm:$0xff] (!%p170_p3)   ;;  %v681_v6 = vld [vmem:[%s807_s1 + $0x20] sm:$0xff] (!%p170_p3)   ;;  %v682_v7 = vld [vmem:[%s807_s1 + $0x28] sm:$0xff] (!%p170_p3)  }
   0x8   : > { %614 = vmatpush3.bf16.msra.mxu0 (!%p170_p3), %v677_v0  ;;  %645 = vmatpush3.bf16.msra.mxu1 (!%p170_p3), %v677_v0  ;;  %v683_v8 = vld [vmem:[%s807_s1 + $0x30] sm:$0xff] (!%p170_p3)   ;;  %v684_v9 = vld [vmem:[%s807_s1 + $0x38] sm:$0xff] (!%p170_p3)   ;;  %v547_v13 = vld [vmem:[%s808_s2] ss:$0 sm:$0xff] (!%p170_p3) }
   0x9   : > { %615 = vmatprep.subr.bf16.mxu0 (!%p170_p3), %v678_v1  ;;  %638 = vmatprep.subr.bf16.mxu1 (!%p170_p3), %v678_v1 }
   0xc   : > { %616 = vmatpush3.bf16.msra.mxu0 (!%p170_p3), %v678_v1  ;;  %646 = vmatpush3.bf16.msra.mxu1 (!%p170_p3), %v678_v1 }
   0xd   : > { %617 = vmatprep.subr.bf16.mxu0 (!%p170_p3), %v679_v2  ;;  %639 = vmatprep.subr.bf16.mxu1 (!%p170_p3), %v679_v2 }
   0xe   : > { %s815_s18 = smov (!%p204_p4, %s543_s18), 15 }
   0xf   : > { %s544_s23 = sshll.u32 %s815_s18, 2 }
  0x10   : > { %s768_s26 = scalar_lea.vmem %s806_s0, %s544_s23  ;;  %618 = vmatpush3.bf16.msra.mxu0 %v679_v2  ;;  %647 = vmatpush3.bf16.msra.mxu1 %v679_v2  ;;  %s223_s17 = scalar_lea.vmem %s809_s3, %s544_s23 }
  0x11   : > { %v685_v4 = vld [vmem:[%s768_s26] sm:$0xff]   ;;  %v686_v5 = vld [vmem:[%s768_s26 + $0x10] sm:$0xff]   ;;  %619 = vmatprep.subr.bf16.mxu0 %v680_v3  ;;  %640 = vmatprep.subr.bf16.mxu1 %v680_v3  ;;  %v687_v10 = vld [vmem:[%s768_s26 + $0x8] sm:$0xff]  }
  0x12   : > { %629 = vmatprep.mubr.bf16.mxu0 %v685_v4  ;;  %633 = vmatprep.mubr.bf16.mxu1 %v686_v5  ;;  %v688_v11 = vld [vmem:[%s768_s26 + $0x18] sm:$0xff]  }
  0x14   : > { %620 = vmatpush3.bf16.msra.mxu0 %v680_v3  ;;  %648 = vmatpush3.bf16.msra.mxu1 %v680_v3 }
  0x15   : > { %621 = vmatprep.subr.bf16.mxu0 %v681_v6  ;;  %641 = vmatprep.subr.bf16.mxu1 %v681_v6 }
  0x18   : > { %622 = vmatpush3.bf16.msra.mxu0 %v681_v6  ;;  %649 = vmatpush3.bf16.msra.mxu1 %v681_v6 }
  0x19   : > { %623 = vmatprep.subr.bf16.mxu0 %v682_v7  ;;  %642 = vmatprep.subr.bf16.mxu1 %v682_v7 }
  0x1c   : > { %624 = vmatpush3.bf16.msra.mxu0 %v682_v7  ;;  %650 = vmatpush3.bf16.msra.mxu1 %v682_v7 }
  0x1d   : > { %625 = vmatprep.subr.bf16.mxu0 %v683_v8  ;;  %643 = vmatprep.subr.bf16.mxu1 %v683_v8 }
  0x20   : > { %626 = vmatpush3.bf16.msra.mxu0 %v683_v8  ;;  %651 = vmatpush3.bf16.msra.mxu1 %v683_v8 }
  0x21   : > { %627 = vmatprep.subr.bf16.mxu0 %v684_v9  ;;  %644 = vmatprep.subr.bf16.mxu1 %v684_v9 }
  0x24   : > { %628 = vmatpush3.bf16.msra.mxu0 %v684_v9  ;;  %652 = vmatpush3.bf16.msra.mxu1 %v684_v9 }
  0x27   : > { %630 = vmatmul.mubr.bf16.vlgmr.msra.gmra.mrb[0].mxu0 %v687_v10  ;;  %634 = vmatmul.mubr.bf16.vlgmr.msra.gmra.mrb[0].mxu1 %v688_v11 }
  0xfa   : > { %v631_v12 = vpop.f32.mrb[0].mxu0  ;;  %v635_v14 = vpop.f32.mrb[0].mxu1 }
  0xfb   : > { %v363_v15 = vpop.f32.mrb[1].mxu0  ;;  %v379_v16 = vpop.f32.mrb[1].mxu1  ;;  %v372_v19 = vadd.f32 %v631_v12, %v547_v13  ;;  %v388_v20 = vadd.f32 %v635_v14, %v547_v13 }
  0xfc   : > { %v632_v17 = vpop.f32.mrb[2].mxu0  ;;  %v636_v18 = vpop.f32.mrb[2].mxu1  ;;  %v364_v25 = vadd.f32 %v547_v13, %v363_v15  ;;  %v380_v26 = vadd.f32 %v547_v13, %v379_v16 }
  0xfd   : > { %v375_v21 = vadd.f32 %v632_v17, %v547_v13  ;;  %v391_v22 = vadd.f32 %v636_v18, %v547_v13  ;;  %v366_v23 = vpop.f32.mrb[3].mxu0  ;;  %v382_v24 = vpop.f32.mrb[3].mxu1 }
  0xfe   : > { %v367_v27 = vadd.f32 %v547_v13, %v366_v23  ;;  %v383_v28 = vadd.f32 %v547_v13, %v382_v24 }
  0xff   : > { %v586_v29 = vpack.c.bf16 %v375_v21, %v372_v19  ;;  %v596_v30 = vpack.c.bf16 %v391_v22, %v388_v20 }
 0x100   : > { %v581_v31 = vpack.c.bf16 %v367_v27, %v364_v25  ;;  %v591_v32 = vpack.c.bf16 %v383_v28, %v380_v26 }
 0x101   : > { %598 = vst [vmem:[%s223_s17 + $0x8] sm:$0xff] %v586_v29   ;;  %600 = vst [vmem:[%s223_s17 + $0x18] sm:$0xff] %v596_v30  }
 0x102   : > { %582 = vst [vmem:[%s223_s17] sm:$0xff] %v581_v31   ;;  %599 = vst [vmem:[%s223_s17 + $0x10] sm:$0xff] %v591_v32  }
 0x103 PF: > { %s13_s14 = sadd.s32 1, %s711_s14   ;;  %s810_s12 = smov %s707_s13 }
 0x104   : > { %p10_p5 = scmp.ge.s32.totalorder %s13_s14, 4   ;;  %s811_s13 = smov %s813_s15 }
 0x106   :  { %12 = sbr.rel (!%p10_p5) target bundleno = 2 (0x2), region = 68 }

// kernel: basic_block_forward.5
= control target key start
LH: loop header
LB: loop body
LE: loop exit
PB: predicated region body
PF: predicated region fallthrough
CT: control target
= control target key end

     0   :  { %s866_s15 = smov 0   ;;  %s868_s16 = smov 0   ;;  %s940_s0 = inlined_call_operand.vmem [shape: bf16[128,128], index: 0, kind: input, shape index: {}]   ;;  %s941_s1 = inlined_call_operand.vmem [shape: bf16[128,128], index: 1, kind: input, shape index: {}]   ;;  %s942_s2 = inlined_call_operand.vmem [shape: f32[1,128], index: 2, kind: input, shape index: {}]   ;;  %s943_s3 = inlined_call_operand.vmem [shape: bf16[128,128], index: 3, kind: input, shape index: {}]   ;;  %s944_s4 = inlined_call_operand.vmem [shape: bf16[128,128], index: 4, kind: output, shape index: {}]  }
   0x1   :  { %s870_s17 = smov 0  }
   0x2 LB: > { %s23_s18 = sadd.s32 1, %s835_s16  ;;  %p649_p0 = scmp.ge.s32.totalorder %s839_s17, 1  ;;  %s839_s17 = sphi %s870_s17, %s14_s17   ;;  %s835_s16 = sphi %s868_s16, %s946_s16   ;;  %s831_s15 = sphi %s866_s15, %s945_s15  }
   0x3   : > { %p24_p1 = scmp.ge.s32.totalorder %s23_s18, 2  ;;  %p210_p2 = scmp.lt.s32.totalorder %s839_s17, 3 }
   0x5   : > { %s948_s18 = smov (%p24_p1, %s23_s18), 0  ;;  %p211_p3 = pnand %p649_p0, %p210_p2 }
   0x6   : > { %v805_v0 = vld [vmem:[%s941_s1] sm:$0xff] (!%p211_p3)   ;;  %s650_s21 = sshll.u32 (!%p211_p3), %s831_s15, 3  ;;  %v806_v1 = vld [vmem:[%s941_s1 + $0x8] sm:$0xff] (!%p211_p3)   ;;  %v807_v2 = vld [vmem:[%s941_s1 + $0x10] sm:$0xff] (!%p211_p3)  }
   0x7   : > { %214 = sbr.rel (%p211_p3) target bundleno = 263 (0x107), region = 36  ;;  %p255_p4 = scmp.lt.s32.totalorder (!%p211_p3), %s650_s21, 15  ;;  %741 = vmatprep.subr.bf16.mxu0 (!%p211_p3), %v805_v0  ;;  %765 = vmatprep.subr.bf16.mxu1 (!%p211_p3), %v805_v0  ;;  %v808_v3 = vld [vmem:[%s941_s1 + $0x18] sm:$0xff] (!%p211_p3)   ;;  %v809_v6 = vld [vmem:[%s941_s1 + $0x20] sm:$0xff] (!%p211_p3)   ;;  %v810_v7 = vld [vmem:[%s941_s1 + $0x28] sm:$0xff] (!%p211_p3)  }
   0x8   : > { %742 = vmatpush3.bf16.msra.mxu0 (!%p211_p3), %v805_v0  ;;  %773 = vmatpush3.bf16.msra.mxu1 (!%p211_p3), %v805_v0  ;;  %v811_v8 = vld [vmem:[%s941_s1 + $0x30] sm:$0xff] (!%p211_p3)   ;;  %v812_v9 = vld [vmem:[%s941_s1 + $0x38] sm:$0xff] (!%p211_p3)   ;;  %v656_v16 = vld [vmem:[%s942_s2] ss:$0 sm:$0xff] (!%p211_p3) }
   0x9   : > { %743 = vmatprep.subr.bf16.mxu0 (!%p211_p3), %v806_v1  ;;  %766 = vmatprep.subr.bf16.mxu1 (!%p211_p3), %v806_v1 }
   0xc   : > { %744 = vmatpush3.bf16.msra.mxu0 (!%p211_p3), %v806_v1  ;;  %774 = vmatpush3.bf16.msra.mxu1 (!%p211_p3), %v806_v1 }
   0xd   : > { %745 = vmatprep.subr.bf16.mxu0 (!%p211_p3), %v807_v2  ;;  %767 = vmatprep.subr.bf16.mxu1 (!%p211_p3), %v807_v2 }
   0xe   : > { %s950_s21 = smov (!%p255_p4, %s650_s21), 15 }
   0xf   : > { %s893_s26 = sshll.u32 %s950_s21, 2 }
  0x10   : > { %s899_s29 = scalar_lea.vmem %s940_s0, %s893_s26  ;;  %746 = vmatpush3.bf16.msra.mxu0 %v807_v2  ;;  %775 = vmatpush3.bf16.msra.mxu1 %v807_v2  ;;  %s274_s19 = scalar_lea.vmem %s943_s3, %s893_s26 }
  0x11   : > { %v813_v4 = vld [vmem:[%s899_s29] sm:$0xff]   ;;  %v814_v5 = vld [vmem:[%s899_s29 + $0x10] sm:$0xff]   ;;  %747 = vmatprep.subr.bf16.mxu0 %v808_v3  ;;  %768 = vmatprep.subr.bf16.mxu1 %v808_v3  ;;  %v815_v10 = vld [vmem:[%s899_s29 + $0x8] sm:$0xff]   ;;  %s283_s24 = scalar_lea.vmem %s944_s4, %s893_s26 }
  0x12   : > { %757 = vmatprep.mubr.bf16.mxu0 %v813_v4  ;;  %761 = vmatprep.mubr.bf16.mxu1 %v814_v5  ;;  %v816_v11 = vld [vmem:[%s899_s29 + $0x18] sm:$0xff]   ;;  %v723_v12 = vld [vmem:[%s274_s19 + $0x8] sm:$0xff]   ;;  %v688_v14 = vld [vmem:[%s274_s19] sm:$0xff]  }
  0x13   : > { %v725_v13 = vld [vmem:[%s274_s19 + $0x18] sm:$0xff]   ;;  %v724_v15 = vld [vmem:[%s274_s19 + $0x10] sm:$0xff]   ;;  %v693_v17 = vunpack.c.l.bf16 %v723_v12  ;;  %v689_v21 = vunpack.c.l.bf16 %v688_v14  ;;  %v694_v27 = vunpack.c.h.bf16 %v723_v12  ;;  %v690_v33 = vunpack.c.h.bf16 %v688_v14 }
  0x14   : > { %748 = vmatpush3.bf16.msra.mxu0 %v808_v3  ;;  %776 = vmatpush3.bf16.msra.mxu1 %v808_v3  ;;  %v701_v18 = vunpack.c.l.bf16 %v725_v13  ;;  %v697_v22 = vunpack.c.l.bf16 %v724_v15  ;;  %v702_v28 = vunpack.c.h.bf16 %v725_v13  ;;  %v698_v34 = vunpack.c.h.bf16 %v724_v15 }
  0x15   : > { %749 = vmatprep.subr.bf16.mxu0 %v809_v6  ;;  %769 = vmatprep.subr.bf16.mxu1 %v809_v6 }
  0x18   : > { %750 = vmatpush3.bf16.msra.mxu0 %v809_v6  ;;  %777 = vmatpush3.bf16.msra.mxu1 %v809_v6 }
  0x19   : > { %751 = vmatprep.subr.bf16.mxu0 %v810_v7  ;;  %770 = vmatprep.subr.bf16.mxu1 %v810_v7 }
  0x1c   : > { %752 = vmatpush3.bf16.msra.mxu0 %v810_v7  ;;  %778 = vmatpush3.bf16.msra.mxu1 %v810_v7 }
  0x1d   : > { %753 = vmatprep.subr.bf16.mxu0 %v811_v8  ;;  %771 = vmatprep.subr.bf16.mxu1 %v811_v8 }
  0x20   : > { %754 = vmatpush3.bf16.msra.mxu0 %v811_v8  ;;  %779 = vmatpush3.bf16.msra.mxu1 %v811_v8 }
  0x21   : > { %755 = vmatprep.subr.bf16.mxu0 %v812_v9  ;;  %772 = vmatprep.subr.bf16.mxu1 %v812_v9 }
  0x24   : > { %756 = vmatpush3.bf16.msra.mxu0 %v812_v9  ;;  %780 = vmatpush3.bf16.msra.mxu1 %v812_v9 }
  0x27   : > { %758 = vmatmul.mubr.bf16.vlgmr.msra.gmra.mrb[0].mxu0 %v815_v10  ;;  %762 = vmatmul.mubr.bf16.vlgmr.msra.gmra.mrb[0].mxu1 %v816_v11 }
  0xfa   : > { %v759_v19 = vpop.f32.mrb[0].mxu0  ;;  %v763_v20 = vpop.f32.mrb[0].mxu1 }
  0xfb   : > { %v432_v23 = vadd.f32 %v759_v19, %v656_v16  ;;  %v448_v24 = vadd.f32 %v763_v20, %v656_v16  ;;  %v423_v25 = vpop.f32.mrb[1].mxu0  ;;  %v439_v26 = vpop.f32.mrb[1].mxu1 }
  0xfc   : > { %v424_v29 = vadd.f32 %v656_v16, %v423_v25  ;;  %v440_v30 = vadd.f32 %v656_v16, %v439_v26  ;;  %v760_v31 = vpop.f32.mrb[2].mxu0  ;;  %v764_v32 = vpop.f32.mrb[2].mxu1 }
  0xfd   : > { %v472_v35 = vadd.f32 %v693_v17, %v432_v23  ;;  %v476_v36 = vadd.f32 %v701_v18, %v448_v24  ;;  %v435_v37 = vadd.f32 %v760_v31, %v656_v16  ;;  %v451_v38 = vadd.f32 %v764_v32, %v656_v16  ;;  %v426_v39 = vpop.f32.mrb[3].mxu0  ;;  %v442_v40 = vpop.f32.mrb[3].mxu1 }
  0xfe   : > { %v470_v41 = vadd.f32 %v689_v21, %v424_v29  ;;  %v474_v42 = vadd.f32 %v697_v22, %v440_v30  ;;  %v427_v43 = vadd.f32 %v656_v16, %v426_v39  ;;  %v443_v44 = vadd.f32 %v656_v16, %v442_v40 }
  0xff   : > { %v473_v45 = vadd.f32 %v694_v27, %v435_v37  ;;  %v477_v46 = vadd.f32 %v702_v28, %v451_v38  ;;  %v480_v49 = vmax.f32 %v472_v35, 0.0  ;;  %v484_v50 = vmax.f32 %v476_v36, 0.0 }
 0x100   : > { %v471_v47 = vadd.f32 %v690_v33, %v427_v43  ;;  %v475_v48 = vadd.f32 %v698_v34, %v443_v44  ;;  %v478_v53 = vmax.f32 %v470_v41, 0.0  ;;  %v482_v54 = vmax.f32 %v474_v42, 0.0 }
 0x101   : > { %v481_v51 = vmax.f32 %v473_v45, 0.0  ;;  %v485_v52 = vmax.f32 %v477_v46, 0.0 }
 0x102   : > { %v479_v55 = vmax.f32 %v471_v47, 0.0  ;;  %v483_v56 = vmax.f32 %v475_v48, 0.0 }
 0x103   : > { %v711_v57 = vpack.c.bf16 %v481_v51, %v480_v49  ;;  %v721_v58 = vpack.c.bf16 %v485_v52, %v484_v50 }
 0x104   : > { %v706_v59 = vpack.c.bf16 %v479_v55, %v478_v53  ;;  %v716_v60 = vpack.c.bf16 %v483_v56, %v482_v54 }
 0x105   : > { %726 = vst [vmem:[%s283_s24 + $0x8] sm:$0xff] %v711_v57   ;;  %728 = vst [vmem:[%s283_s24 + $0x18] sm:$0xff] %v721_v58  }
 0x106   : > { %707 = vst [vmem:[%s283_s24] sm:$0xff] %v706_v59   ;;  %727 = vst [vmem:[%s283_s24 + $0x10] sm:$0xff] %v716_v60  }
 0x107 PF: > { %s14_s17 = sadd.s32 1, %s839_s17   ;;  %s945_s15 = smov %s835_s16 }
 0x108   : > { %p11_p5 = scmp.ge.s32.totalorder %s14_s17, 4   ;;  %s946_s16 = smov %s948_s18 }
 0x10a   :  { %13 = sbr.rel (!%p11_p5) target bundleno = 2 (0x2), region = 75 }

</bundles_post_ra>
